<compile_context>
chip_gen: v5e
topology: v5e:2x2
jax: 0.10.0
libtpu: 0.0.40
codegen_flags: <defaults>
</compile_context>

<pallas_src>
import numpy as np
import jax
import jax.numpy as jnp
from jax.experimental import pallas as pl
from jax.experimental.pallas import tpu as pltpu


# Max bytes for the double-buffered VMEM-resident XW copy (2 * Np * Fp * 2B).
_XW_RESIDENT_BYTES = 16 * 1024 * 1024


# ----------------------------------------------------------------------------
# Pallas kernel: one fused hypergraph propagation layer
#   out[i] = PReLU( (sum_k S[i,k] @ XW[k]) + b (+ residual[i]) )
# ----------------------------------------------------------------------------
def _make_hconv_kernel(has_residual, xw_resident, tk):
    def kernel(a_ref, s_ref, xw_ref, b_ref, *rest):
        if has_residual:
            res_ref, o_ref, acc_ref = rest
        else:
            o_ref, acc_ref = rest

        k = pl.program_id(1)

        @pl.when(k == 0)
        def _():
            acc_ref[...] = jnp.zeros_like(acc_ref)

        if xw_resident:
            # XW lives whole in VMEM (constant block index -> DMA'd once);
            # slice the contraction window in-kernel instead of re-streaming.
            start = pl.multiple_of(k * tk, tk)
            xw = xw_ref[pl.ds(start, tk), :]
        else:
            xw = xw_ref[...]

        # bf16 x bf16 -> f32 accumulate on the MXU
        acc_ref[...] += jnp.dot(s_ref[...], xw,
                                preferred_element_type=jnp.float32)

        @pl.when(k == pl.num_programs(1) - 1)
        def _():
            a = a_ref[0, 0]
            y = acc_ref[...] + b_ref[...]
            if has_residual:
                y = y + res_ref[...]
            y = jnp.where(y > 0, y, a * y)          # PReLU, f32
            o_ref[...] = y.astype(o_ref.dtype)

    return kernel


def _hconv(S_bf16, xw_bf16, b_f32, prelu_a, residual_f32, out_dtype, tm, tk):
    Np = S_bf16.shape[0]
    Fp = xw_bf16.shape[1]
    grid = (Np // tm, Np // tk)

    # Keep XW fully VMEM-resident when it fits (double-buffer accounted).
    xw_resident = (2 * Np * Fp * 2) <= _XW_RESIDENT_BYTES

    in_specs = [
        pl.BlockSpec(memory_space=pltpu.MemorySpace.SMEM),      # PReLU slope
        pl.BlockSpec((tm, tk), lambda i, k: (i, k)),            # S tile
    ]
    if xw_resident:
        in_specs.append(pl.BlockSpec((Np, Fp), lambda i, k: (0, 0)))   # XW full
    else:
        in_specs.append(pl.BlockSpec((tk, Fp), lambda i, k: (k, 0)))   # XW tile
    in_specs.append(pl.BlockSpec((1, Fp), lambda i, k: (0, 0)))        # bias

    args = [prelu_a, S_bf16, xw_bf16, b_f32]

    has_residual = residual_f32 is not None
    if has_residual:
        in_specs.append(pl.BlockSpec((tm, Fp), lambda i, k: (i, 0)))
        args.append(residual_f32)

    return pl.pallas_call(
        _make_hconv_kernel(has_residual, xw_resident, tk),
        out_shape=jax.ShapeDtypeStruct((Np, Fp), out_dtype),
        grid_spec=pltpu.PrefetchScalarGridSpec(
            num_scalar_prefetch=0,
            grid=grid,
            in_specs=in_specs,
            out_specs=pl.BlockSpec((tm, Fp), lambda i, k: (i, 0)),
            scratch_shapes=[pltpu.VMEM((tm, Fp), jnp.float32)],
        ),
        compiler_params=pltpu.CompilerParams(
            dimension_semantics=("parallel", "arbitrary"),
            vmem_limit_bytes=48 * 1024 * 1024,      # fits v7x 64 MiB physical
        ),
    )(*args)


# ----------------------------------------------------------------------------
# Wrapper: pad to lane/tile-friendly shapes, run the two fused conv layers.
# ----------------------------------------------------------------------------
def _round_up(x, m):
    return (x + m - 1) // m * m


def _choose_tiles(n):
    n0 = _round_up(max(n, 1), 128)
    # Pad larger graphs to a multiple of 512 (bounded waste) so contraction
    # tiles of >=512 can be used; tiny graphs stay 128-granular.
    Np = _round_up(n0, 512) if n0 >= 512 else n0

    # Contraction tile: largest power-of-two <= 2048 dividing Np
    # -> per-step S DMA of 512 KiB .. 2 MiB in bf16 (with tm=512).
    tk = 128
    for cand in (2048, 1024, 512, 256, 128):
        if Np % cand == 0:
            tk = cand
            break

    # Row tile: large for DMA amortization, but keep >=2 row tiles whenever
    # possible so the "parallel" axis shards across both v7x TensorCores.
    tm = 128
    for cand in (512, 256, 128):
        if Np % cand == 0 and Np // cand >= 2:
            tm = cand
            break
    if Np // tm < 2:        # only happens for Np == 128
        tm = Np
    return Np, tm, tk


def hypergraph_structural_layer_forward(x, w1, b1, w2, b2, S, prelu_a):
    N, F = x.shape
    Fp = _round_up(F, 128)
    Np, tm, tk = _choose_tiles(N)

    def pad2(a, r, c):
        return jnp.pad(a, ((0, r - a.shape[0]), (0, c - a.shape[1])))

    x_f32 = pad2(x.astype(jnp.float32), Np, Fp)
    S_bf = pad2(S.astype(jnp.float32), Np, Np).astype(jnp.bfloat16)
    w1_f = pad2(w1.astype(jnp.float32), Fp, Fp)
    w2_f = pad2(w2.astype(jnp.float32), Fp, Fp)
    b1_p = pad2(b1.astype(jnp.float32), 1, Fp)
    b2_p = pad2(b2.astype(jnp.float32), 1, Fp)

    # Hoisted tiny N x F x F matmuls (plain XLA ops, f32 accumulate) -> kernel
    # only streams S and accumulates S @ XW.
    # Layer 1:  out1 = PReLU(S @ (x @ W1) + b1)
    xw1 = jnp.dot(x_f32, w1_f,
                  preferred_element_type=jnp.float32).astype(jnp.bfloat16)
    out1 = _hconv(S_bf, xw1, b1_p, prelu_a, None, jnp.float32, tm, tk)

    # Layer 2:  out2 = PReLU(S @ (out1 @ W2) + b2 + x)
    xw2 = jnp.dot(out1, w2_f,
                  preferred_element_type=jnp.float32).astype(jnp.bfloat16)
    out2 = _hconv(S_bf, xw2, b2_p, prelu_a, x_f32, jnp.float32, tm, tk)
    return out2[:N, :F]


hypergraph_forward = jax.jit(hypergraph_structural_layer_forward)


# ----------------------------------------------------------------------------
# Host-side glue: graph -> communities -> per-community kNN hyperedges -> S
# ----------------------------------------------------------------------------
def build_hyperedge_index(edge_index_np, x_np, num_nodes, k=5):
    # TODO(synk): Louvain partition replaced by connected components (host glue).
    edge_list = edge_index_np.T.tolist()
    if len(edge_list) == 0:
        if num_nodes > 1:
            edge_list = [[i, j] for i in range(num_nodes)
                         for j in range(i + 1, num_nodes)]
        elif num_nodes == 1:
            edge_list = [[0, 0]]

    parent = list(range(num_nodes))

    def find(i):
        while parent[i] != i:
            parent[i] = parent[parent[i]]
            i = parent[i]
        return i

    nodes_in_graph = set()
    for u, v in edge_list:
        nodes_in_graph.add(u)
        nodes_in_graph.add(v)
        ru, rv = find(u), find(v)
        if ru != rv:
            parent[ru] = rv

    communities = {}
    for node in sorted(nodes_in_graph):
        communities.setdefault(find(node), []).append(node)

    pairs = []
    for cnodes in communities.values():
        if len(cnodes) <= 1:
            continue
        feats = x_np[cnodes]                                   # [m, F]
        d2 = ((feats[:, None, :] - feats[None, :, :]) ** 2).sum(-1)
        kk = min(k, len(cnodes))
        order = np.argsort(d2, axis=1, kind="stable")[:, :kk]  # self at pos 0
        for i, nbrs in enumerate(order):
            for nbr in nbrs[1:]:
                pairs.append([cnodes[i], cnodes[int(nbr)]])

    if not pairs:
        return np.zeros((2, 0), dtype=np.int64)
    return np.array(pairs, dtype=np.int64).T                   # [2, K]


def build_propagation_matrix(hyper_edge_index, num_nodes):
    # Dense S = D^-1 H B^-1 H^T  (hyperedge ids are node ids < N; zero columns
    # are inert and drop out of the product, so no compaction is needed).
    E = num_nodes
    H = np.zeros((num_nodes, E), dtype=np.float64)
    if hyper_edge_index.size:
        for v, e in zip(hyper_edge_index[0], hyper_edge_index[1]):
            H[int(v), int(e)] += 1.0
    deg_v = H.sum(axis=1)
    deg_e = H.sum(axis=0)
    dinv = np.where(deg_v > 0, 1.0 / np.maximum(deg_v, 1e-30), 0.0)
    binv = np.where(deg_e > 0, 1.0 / np.maximum(deg_e, 1e-30), 0.0)
    S = (dinv[:, None] * H) @ (binv[:, None] * H.T)
    return S.astype(np.float32)


# ----------------------------------------------------------------------------
if __name__ == "__main__":
    N = 16          # nodes
    hidden = 32     # hidden_dim
    n_heads = 4     # out_dim = n_heads * hidden // n_heads = hidden
    # note: self.dropout is never applied in forward (conv dropout only affects
    # the disabled attention path), so there is no dropout in the hot path.

    key = jax.random.PRNGKey(0)
    kx, kw1, kw2 = jax.random.split(key, 3)

    # node features
    x = jax.random.normal(kx, (N, hidden), dtype=jnp.float32)

    # deterministic graph: two 8-node rings -> two connected components
    edges = []
    for base in (0, 8):
        for i in range(8):
            edges.append([base + i, base + (i + 1) % 8])
    edge_index = np.array(edges, dtype=np.int64).T              # [2, num_edges]

    x_np = np.asarray(x)
    hyper_edge_index = build_hyperedge_index(edge_index, x_np, N, k=5)
    S_np = build_propagation_matrix(hyper_edge_index, N)

    # HypergraphConv linear weights (kaiming_normal, bias zeros), PReLU a=0.25
    std = np.sqrt(2.0 / hidden)
    w1 = jax.random.normal(kw1, (hidden, hidden), dtype=jnp.float32) * std
    w2 = jax.random.normal(kw2, (hidden, hidden), dtype=jnp.float32) * std
    b1 = jnp.zeros((1, hidden), dtype=jnp.float32)
    b2 = jnp.zeros((1, hidden), dtype=jnp.float32)
    prelu_a = jnp.full((1, 1), 0.25, dtype=jnp.float32)  # single shared nn.PReLU

    out = hypergraph_forward(x, w1, b1, w2, b2, jnp.asarray(S_np), prelu_a)
    jax.block_until_ready(out)
    assert out.shape == (N, hidden) and out.dtype == jnp.float32
    print("KERNEL_OK")
</pallas_src>

<mosaic_0001>
module attributes {stable_mosaic.version = 11 : i64} {
  func.func @kernel(%arg0: i32, %arg1: i32, %arg2: memref<1x1xf32, #tpu.memory_space<smem>>, %arg3: memref<128x128xbf16, #tpu.memory_space<vmem>>, %arg4: memref<128x128xbf16, #tpu.memory_space<vmem>>, %arg5: memref<1x128xf32, #tpu.memory_space<vmem>>, %arg6: memref<128x128xf32, #tpu.memory_space<vmem>>, %arg7: memref<128x128xf32, #tpu.memory_space<vmem>>) attributes {dimension_semantics = [#tpu.dimension_semantics<parallel>, #tpu.dimension_semantics<arbitrary>], iteration_bounds = array<i64: 1, 1>, scalar_prefetch = 0 : i64, scratch_operands = 1 : i64, tpu.core_type = #tpu.core_type<tc>, window_params = [{transform_indices = @transform_0, window_bounds = array<i64: 1, 1>}, {transform_indices = @transform_1, window_bounds = array<i64: 128, 128>}, {pipeline_mode = #tpu.pipeline_mode<synchronous>, transform_indices = @transform_2, window_bounds = array<i64: 128, 128>}, {pipeline_mode = #tpu.pipeline_mode<synchronous>, transform_indices = @transform_3, window_bounds = array<i64: 1, 128>}, {transform_indices = @transform_4, window_bounds = array<i64: 128, 128>}]} {
    %c0_i32 = arith.constant 0 : i32
    %0 = arith.cmpi eq, %arg1, %c0_i32 : i32
    %1 = arith.extui %0 : i1 to i32
    %c0_i32_0 = arith.constant 0 : i32
    %2 = arith.cmpi ne, %1, %c0_i32_0 : i32
    scf.if %2 {
      %cst_9 = arith.constant 0.000000e+00 : f32
      %15 = vector.broadcast %cst_9 : f32 to vector<128x128xf32>
      %c0_10 = arith.constant 0 : index
      %c0_11 = arith.constant 0 : index
      %16 = vector.load %arg7[%c0_10, %c0_11] : memref<128x128xf32, #tpu.memory_space<vmem>>, vector<128x128xf32>
      tpu.vector_store %arg7[%c0_10, %c0_11], %15 {strides = array<i32>} : memref<128x128xf32, #tpu.memory_space<vmem>>, vector<128x128xf32>,
    } else {
    }
    %c128_i32 = arith.constant 128 : i32
    %3 = arith.muli %arg1, %c128_i32 : i32
    %4 = tpu.assume_multiple %3, 128 : i32
    %5 = arith.index_cast %4 : i32 to index
    %c0 = arith.constant 0 : index
    %6 = vector.load %arg4[%5, %c0] : memref<128x128xbf16, #tpu.memory_space<vmem>>, vector<128x128xbf16>
    %c0_1 = arith.constant 0 : index
    %c0_2 = arith.constant 0 : index
    %7 = vector.load %arg7[%c0_1, %c0_2] : memref<128x128xf32, #tpu.memory_space<vmem>>, vector<128x128xf32>
    %c0_3 = arith.constant 0 : index
    %c0_4 = arith.constant 0 : index
    %8 = vector.load %arg3[%c0_3, %c0_4] : memref<128x128xbf16, #tpu.memory_space<vmem>>, vector<128x128xbf16>
    %cst = arith.constant dense<0.000000e+00> : vector<128x128xf32>
    %9 = tpu.matmul %8, %6, %cst {dimension_numbers = #tpu.dot_dimension_numbers<[1], [0], [0], [1], [0, 0, 1, 1], [], []>} : vector<128x128xbf16>, vector<128x128xbf16>, vector<128x128xf32> -> vector<128x128xf32>
    %10 = arith.addf %7, %9 : vector<128x128xf32>
    %c0_5 = arith.constant 0 : index
    %c0_6 = arith.constant 0 : index
    %11 = vector.load %arg7[%c0_5, %c0_6] : memref<128x128xf32, #tpu.memory_space<vmem>>, vector<128x128xf32>
    tpu.vector_store %arg7[%c0_5, %c0_6], %10 {strides = array<i32>} : memref<128x128xf32, #tpu.memory_space<vmem>>, vector<128x128xf32>,
    %c0_i32_7 = arith.constant 0 : i32
    %12 = arith.cmpi eq, %arg1, %c0_i32_7 : i32
    %13 = arith.extui %12 : i1 to i32
    %c0_i32_8 = arith.constant 0 : i32
    %14 = arith.cmpi ne, %13, %c0_i32_8 : i32
    scf.if %14 {
      %c0_9 = arith.constant 0 : index
      %c0_10 = arith.constant 0 : index
      %15 = memref.load %arg2[%c0_9, %c0_10] : memref<1x1xf32, #tpu.memory_space<smem>>
      %c0_11 = arith.constant 0 : index
      %c0_12 = arith.constant 0 : index
      %16 = vector.load %arg7[%c0_11, %c0_12] : memref<128x128xf32, #tpu.memory_space<vmem>>, vector<128x128xf32>
      %c0_13 = arith.constant 0 : index
      %c0_14 = arith.constant 0 : index
      %17 = vector.load %arg5[%c0_13, %c0_14] : memref<1x128xf32, #tpu.memory_space<vmem>>, vector<1x128xf32>
      %18 = vector.broadcast %17 : vector<1x128xf32> to vector<128x128xf32>
      %19 = arith.addf %16, %18 : vector<128x128xf32>
      %cst_15 = arith.constant 0.000000e+00 : f32
      %20 = vector.broadcast %cst_15 : f32 to vector<128x128xf32>
      %21 = arith.cmpf ogt, %19, %20 : vector<128x128xf32>
      %22 = vector.broadcast %15 : f32 to vector<128x128xf32>
      %23 = arith.mulf %22, %19 : vector<128x128xf32>
      %24 = arith.select %21, %19, %23 : vector<128x128xi1>, vector<128x128xf32>
      %c0_16 = arith.constant 0 : index
      %c0_17 = arith.constant 0 : index
      %25 = vector.load %arg6[%c0_16, %c0_17] : memref<128x128xf32, #tpu.memory_space<vmem>>, vector<128x128xf32>
      tpu.vector_store %arg6[%c0_16, %c0_17], %24 {strides = array<i32>} : memref<128x128xf32, #tpu.memory_space<vmem>>, vector<128x128xf32>,
    } else {
    }
    return
  }
  func.func @transform_0(%arg0: i32, %arg1: i32) -> (i32, i32) {
    %c0_i32 = arith.constant 0 : i32
    %c0_i32_0 = arith.constant 0 : i32
    %c0_i32_1 = arith.constant 0 : i32
    return %c0_i32, %c0_i32_0 : i32, i32
  }
  func.func @transform_1(%arg0: i32, %arg1: i32) -> (i32, i32) {
    %c0_i32 = arith.constant 0 : i32
    return %arg0, %arg1 : i32, i32
  }
  func.func @transform_2(%arg0: i32, %arg1: i32) -> (i32, i32) {
    %c0_i32 = arith.constant 0 : i32
    %c0_i32_0 = arith.constant 0 : i32
    %c0_i32_1 = arith.constant 0 : i32
    return %c0_i32, %c0_i32_0 : i32, i32
  }
  func.func @transform_3(%arg0: i32, %arg1: i32) -> (i32, i32) {
    %c0_i32 = arith.constant 0 : i32
    %c0_i32_0 = arith.constant 0 : i32
    %c0_i32_1 = arith.constant 0 : i32
    return %c0_i32, %c0_i32_0 : i32, i32
  }
  func.func @transform_4(%arg0: i32, %arg1: i32) -> (i32, i32) {
    %c0_i32 = arith.constant 0 : i32
    %c0_i32_0 = arith.constant 0 : i32
    return %arg0, %c0_i32 : i32, i32
  }
}

module attributes {stable_mosaic.version = 11 : i64} {
  func.func @kernel(%arg0: i32, %arg1: i32, %arg2: memref<1x1xf32, #tpu.memory_space<smem>>, %arg3: memref<128x128xbf16, #tpu.memory_space<vmem>>, %arg4: memref<128x128xbf16, #tpu.memory_space<vmem>>, %arg5: memref<1x128xf32, #tpu.memory_space<vmem>>, %arg6: memref<128x128xf32, #tpu.memory_space<vmem>>, %arg7: memref<128x128xf32, #tpu.memory_space<vmem>>, %arg8: memref<128x128xf32, #tpu.memory_space<vmem>>) attributes {dimension_semantics = [#tpu.dimension_semantics<parallel>, #tpu.dimension_semantics<arbitrary>], iteration_bounds = array<i64: 1, 1>, scalar_prefetch = 0 : i64, scratch_operands = 1 : i64, tpu.core_type = #tpu.core_type<tc>, window_params = [{transform_indices = @transform_0, window_bounds = array<i64: 1, 1>}, {transform_indices = @transform_1, window_bounds = array<i64: 128, 128>}, {pipeline_mode = #tpu.pipeline_mode<synchronous>, transform_indices = @transform_2, window_bounds = array<i64: 128, 128>}, {pipeline_mode = #tpu.pipeline_mode<synchronous>, transform_indices = @transform_3, window_bounds = array<i64: 1, 128>}, {transform_indices = @transform_4, window_bounds = array<i64: 128, 128>}, {transform_indices = @transform_5, window_bounds = array<i64: 128, 128>}]} {
    %c0_i32 = arith.constant 0 : i32
    %0 = arith.cmpi eq, %arg1, %c0_i32 : i32
    %1 = arith.extui %0 : i1 to i32
    %c0_i32_0 = arith.constant 0 : i32
    %2 = arith.cmpi ne, %1, %c0_i32_0 : i32
    scf.if %2 {
      %cst_9 = arith.constant 0.000000e+00 : f32
      %15 = vector.broadcast %cst_9 : f32 to vector<128x128xf32>
      %c0_10 = arith.constant 0 : index
      %c0_11 = arith.constant 0 : index
      %16 = vector.load %arg8[%c0_10, %c0_11] : memref<128x128xf32, #tpu.memory_space<vmem>>, vector<128x128xf32>
      tpu.vector_store %arg8[%c0_10, %c0_11], %15 {strides = array<i32>} : memref<128x128xf32, #tpu.memory_space<vmem>>, vector<128x128xf32>,
    } else {
    }
    %c128_i32 = arith.constant 128 : i32
    %3 = arith.muli %arg1, %c128_i32 : i32
    %4 = tpu.assume_multiple %3, 128 : i32
    %5 = arith.index_cast %4 : i32 to index
    %c0 = arith.constant 0 : index
    %6 = vector.load %arg4[%5, %c0] : memref<128x128xbf16, #tpu.memory_space<vmem>>, vector<128x128xbf16>
    %c0_1 = arith.constant 0 : index
    %c0_2 = arith.constant 0 : index
    %7 = vector.load %arg8[%c0_1, %c0_2] : memref<128x128xf32, #tpu.memory_space<vmem>>, vector<128x128xf32>
    %c0_3 = arith.constant 0 : index
    %c0_4 = arith.constant 0 : index
    %8 = vector.load %arg3[%c0_3, %c0_4] : memref<128x128xbf16, #tpu.memory_space<vmem>>, vector<128x128xbf16>
    %cst = arith.constant dense<0.000000e+00> : vector<128x128xf32>
    %9 = tpu.matmul %8, %6, %cst {dimension_numbers = #tpu.dot_dimension_numbers<[1], [0], [0], [1], [0, 0, 1, 1], [], []>} : vector<128x128xbf16>, vector<128x128xbf16>, vector<128x128xf32> -> vector<128x128xf32>
    %10 = arith.addf %7, %9 : vector<128x128xf32>
    %c0_5 = arith.constant 0 : index
    %c0_6 = arith.constant 0 : index
    %11 = vector.load %arg8[%c0_5, %c0_6] : memref<128x128xf32, #tpu.memory_space<vmem>>, vector<128x128xf32>
    tpu.vector_store %arg8[%c0_5, %c0_6], %10 {strides = array<i32>} : memref<128x128xf32, #tpu.memory_space<vmem>>, vector<128x128xf32>,
    %c0_i32_7 = arith.constant 0 : i32
    %12 = arith.cmpi eq, %arg1, %c0_i32_7 : i32
    %13 = arith.extui %12 : i1 to i32
    %c0_i32_8 = arith.constant 0 : i32
    %14 = arith.cmpi ne, %13, %c0_i32_8 : i32
    scf.if %14 {
      %c0_9 = arith.constant 0 : index
      %c0_10 = arith.constant 0 : index
      %15 = memref.load %arg2[%c0_9, %c0_10] : memref<1x1xf32, #tpu.memory_space<smem>>
      %c0_11 = arith.constant 0 : index
      %c0_12 = arith.constant 0 : index
      %16 = vector.load %arg8[%c0_11, %c0_12] : memref<128x128xf32, #tpu.memory_space<vmem>>, vector<128x128xf32>
      %c0_13 = arith.constant 0 : index
      %c0_14 = arith.constant 0 : index
      %17 = vector.load %arg5[%c0_13, %c0_14] : memref<1x128xf32, #tpu.memory_space<vmem>>, vector<1x128xf32>
      %18 = vector.broadcast %17 : vector<1x128xf32> to vector<128x128xf32>
      %19 = arith.addf %16, %18 : vector<128x128xf32>
      %c0_15 = arith.constant 0 : index
      %c0_16 = arith.constant 0 : index
      %20 = vector.load %arg6[%c0_15, %c0_16] : memref<128x128xf32, #tpu.memory_space<vmem>>, vector<128x128xf32>
      %21 = arith.addf %19, %20 : vector<128x128xf32>
      %cst_17 = arith.constant 0.000000e+00 : f32
      %22 = vector.broadcast %cst_17 : f32 to vector<128x128xf32>
      %23 = arith.cmpf ogt, %21, %22 : vector<128x128xf32>
      %24 = vector.broadcast %15 : f32 to vector<128x128xf32>
      %25 = arith.mulf %24, %21 : vector<128x128xf32>
      %26 = arith.select %23, %21, %25 : vector<128x128xi1>, vector<128x128xf32>
      %c0_18 = arith.constant 0 : index
      %c0_19 = arith.constant 0 : index
      %27 = vector.load %arg7[%c0_18, %c0_19] : memref<128x128xf32, #tpu.memory_space<vmem>>, vector<128x128xf32>
      tpu.vector_store %arg7[%c0_18, %c0_19], %26 {strides = array<i32>} : memref<128x128xf32, #tpu.memory_space<vmem>>, vector<128x128xf32>,
    } else {
    }
    return
  }
  func.func @transform_0(%arg0: i32, %arg1: i32) -> (i32, i32) {
    %c0_i32 = arith.constant 0 : i32
    %c0_i32_0 = arith.constant 0 : i32
    %c0_i32_1 = arith.constant 0 : i32
    return %c0_i32, %c0_i32_0 : i32, i32
  }
  func.func @transform_1(%arg0: i32, %arg1: i32) -> (i32, i32) {
    %c0_i32 = arith.constant 0 : i32
    return %arg0, %arg1 : i32, i32
  }
  func.func @transform_2(%arg0: i32, %arg1: i32) -> (i32, i32) {
    %c0_i32 = arith.constant 0 : i32
    %c0_i32_0 = arith.constant 0 : i32
    %c0_i32_1 = arith.constant 0 : i32
    return %c0_i32, %c0_i32_0 : i32, i32
  }
  func.func @transform_3(%arg0: i32, %arg1: i32) -> (i32, i32) {
    %c0_i32 = arith.constant 0 : i32
    %c0_i32_0 = arith.constant 0 : i32
    %c0_i32_1 = arith.constant 0 : i32
    return %c0_i32, %c0_i32_0 : i32, i32
  }
  func.func @transform_4(%arg0: i32, %arg1: i32) -> (i32, i32) {
    %c0_i32 = arith.constant 0 : i32
    %c0_i32_0 = arith.constant 0 : i32
    return %arg0, %c0_i32 : i32, i32
  }
  func.func @transform_5(%arg0: i32, %arg1: i32) -> (i32, i32) {
    %c0_i32 = arith.constant 0 : i32
    %c0_i32_0 = arith.constant 0 : i32
    return %arg0, %c0_i32 : i32, i32
  }
}

</mosaic_0001>

<bundles_post_ra>
// kernel: hypergraph_structural_layer_forward.3
= control target key start
LH: loop header
LB: loop body
LE: loop exit
PB: predicated region body
PF: predicated region fallthrough
CT: control target
= control target key end

     0   :  { %s735_s2 = inlined_call_operand.vmem [shape: bf16[128,128], index: 2, kind: input, shape index: {}]   ;;  %s736_s3 = inlined_call_operand.vmem [shape: f32[1,128], index: 3, kind: input, shape index: {}]   ;;  %s737_s1 = inlined_call_operand.vmem [shape: bf16[128,128], index: 1, kind: input, shape index: {}]   ;;  %s738_s4 = inlined_call_operand.vmem [shape: f32[128,128], index: 4, kind: input, shape index: {}]   ;;  %s739_s0 = inlined_call_operand.<no memory space> [shape: f32[1,1], index: 0, kind: input, shape index: {}]   ;;  %s740_s5 = inlined_call_operand.vmem [shape: f32[128,128], index: 5, kind: output, shape index: {}]  }
   0x1   :  { %v485_v0 = vld [vmem:[%s735_s2 + $0x38] sm:$0xff]  ;;  %v484_v1 = vld [vmem:[%s735_s2 + $0x30] sm:$0xff]  ;;  %v483_v2 = vld [vmem:[%s735_s2 + $0x28] sm:$0xff]  ;;  %v613_v23 = vstv %s739_s0 }
   0x2   :  { %190 = vmatpush.bf16.msra.mxu0 %v485_v0  ;;  %494 = vmatpush.bf16.msra.mxu1 %v485_v0  ;;  %v482_v3 = vld [vmem:[%s735_s2 + $0x20] sm:$0xff]  ;;  %v481_v4 = vld [vmem:[%s735_s2 + $0x18] sm:$0xff]  ;;  %v480_v5 = vld [vmem:[%s735_s2 + $0x10] sm:$0xff] }
   0x3   :  { %495 = vmatpush.bf16.msra.mxu2 %v485_v0  ;;  %496 = vmatpush.bf16.msra.mxu3 %v485_v0  ;;  %v479_v6 = vld [vmem:[%s735_s2 + $0x8] sm:$0xff]  ;;  %v478_v7 = vld [vmem:[%s735_s2] sm:$0xff]  ;;  %v488_v9 = vld [vmem:[%s737_s1 + $0x10] sm:$0xff] }
   0x4   :  { %v486_v8 = vld [vmem:[%s737_s1] sm:$0xff]  ;;  %v492_v11 = vld [vmem:[%s737_s1 + $0x30] sm:$0xff]  ;;  %v487_v12 = vld [vmem:[%s737_s1 + $0x8] sm:$0xff] }
   0x5   :  { %v490_v10 = vld [vmem:[%s737_s1 + $0x20] sm:$0xff]  ;;  %v489_v13 = vld [vmem:[%s737_s1 + $0x18] sm:$0xff]  ;;  %v491_v14 = vld [vmem:[%s737_s1 + $0x28] sm:$0xff] }
   0x6   :  { %191 = vmatpush.bf16.msra.mxu0 %v484_v1  ;;  %497 = vmatpush.bf16.msra.mxu1 %v484_v1  ;;  %v493_v15 = vld [vmem:[%s737_s1 + $0x38] sm:$0xff]  ;;  %v600_v16 = vld [vmem:[%s736_s3] ss:$0 sm:$0xff]  ;;  %v312_v37 = vld [vmem:[%s738_s4 + $0x8] sm:$0xff] }
   0x7   :  { %498 = vmatpush.bf16.msra.mxu2 %v484_v1  ;;  %499 = vmatpush.bf16.msra.mxu3 %v484_v1  ;;  %v311_v18 = vld [vmem:[%s738_s4] sm:$0xff]  ;;  %v316_v39 = vld [vmem:[%s738_s4 + $0x28] sm:$0xff]  ;;  %v313_v61 = vld [vmem:[%s738_s4 + $0x10] sm:$0xff] }
   0x8   :  { %v315_v20 = vld [vmem:[%s738_s4 + $0x20] sm:$0xff]  ;;  %v320_v55 = vld [vmem:[%s738_s4 + $0x48] sm:$0xff]  ;;  %v317_v63 = vld [vmem:[%s738_s4 + $0x30] sm:$0xff] }
   0x9   :  { %v319_v31 = vld [vmem:[%s738_s4 + $0x40] sm:$0xff]  ;;  %v324_v57 = vld [vmem:[%s738_s4 + $0x68] sm:$0xff] }
   0xa   :  { %192 = vmatpush.bf16.msra.mxu0 %v483_v2  ;;  %500 = vmatpush.bf16.msra.mxu1 %v483_v2  ;;  %v323_v33 = vld [vmem:[%s738_s4 + $0x60] sm:$0xff] }
   0xb   :  { %501 = vmatpush.bf16.msra.mxu2 %v483_v2  ;;  %502 = vmatpush.bf16.msra.mxu3 %v483_v2 }
   0xe   :  { %193 = vmatpush.bf16.msra.mxu0 %v482_v3  ;;  %503 = vmatpush.bf16.msra.mxu1 %v482_v3 }
   0xf   :  { %504 = vmatpush.bf16.msra.mxu2 %v482_v3  ;;  %505 = vmatpush.bf16.msra.mxu3 %v482_v3 }
  0x12   :  { %194 = vmatpush.bf16.msra.mxu0 %v481_v4  ;;  %506 = vmatpush.bf16.msra.mxu1 %v481_v4 }
  0x13   :  { %507 = vmatpush.bf16.msra.mxu2 %v481_v4  ;;  %508 = vmatpush.bf16.msra.mxu3 %v481_v4 }
  0x16   :  { %195 = vmatpush.bf16.msra.mxu0 %v480_v5  ;;  %509 = vmatpush.bf16.msra.mxu1 %v480_v5 }
  0x17   :  { %510 = vmatpush.bf16.msra.mxu2 %v480_v5  ;;  %511 = vmatpush.bf16.msra.mxu3 %v480_v5 }
  0x1a   :  { %196 = vmatpush.bf16.msra.mxu0 %v479_v6  ;;  %512 = vmatpush.bf16.msra.mxu1 %v479_v6 }
  0x1b   :  { %513 = vmatpush.bf16.msra.mxu2 %v479_v6  ;;  %514 = vmatpush.bf16.msra.mxu3 %v479_v6 }
  0x1e   :  { %197 = vmatpush.bf16.msra.mxu0 %v478_v7  ;;  %515 = vmatpush.bf16.msra.mxu1 %v478_v7 }
  0x1f   :  { %516 = vmatpush.bf16.msra.mxu2 %v478_v7  ;;  %517 = vmatpush.bf16.msra.mxu3 %v478_v7 }
  0x21   :  { %198 = vmatmul.bf16.vlgmr.msra.gmra.mxu0 %v486_v8  ;;  %208 = vmatmul.bf16.vlgmr.msra.gmra.mxu1 %v488_v9 }
  0x22   :  { %218 = vmatmul.bf16.vlgmr.msra.gmra.mxu2 %v490_v10  ;;  %228 = vmatmul.bf16.vlgmr.msra.gmra.mxu3 %v492_v11 }
  0x31   :  { %203 = vmatmul.bf16.gmra.mxu0 %v487_v12  ;;  %213 = vmatmul.bf16.gmra.mxu1 %v489_v13 }
  0x32   :  { %223 = vmatmul.bf16.gmra.mxu2 %v491_v14  ;;  %233 = vmatmul.bf16.gmra.mxu3 %v493_v15  ;;  %v321_v15 = vld [vmem:[%s738_s4 + $0x50] sm:$0xff] }
  0x9e   :  { %v199_v17 = vpop.f32.mrf.mxu0  ;;  %v209_v19 = vpop.f32.mrf.mxu1 }
  0x9f   :  { %v295_v21 = vadd.f32 %v600_v16, %v199_v17  ;;  %v299_v22 = vadd.f32 %v600_v16, %v209_v19 }
  0xa1   :  { %v327_v24 = vadd.f32 %v311_v18, %v295_v21  ;;  %v331_v25 = vadd.f32 %v315_v20, %v299_v22  ;;  %v325_v18 = vld [vmem:[%s738_s4 + $0x70] sm:$0xff]  ;;  %v314_v22 = vld [vmem:[%s738_s4 + $0x18] sm:$0xff] }
  0xa3   :  { %vm343_vm0 = vcmp.gt.f32.partialorder %v327_v24, 0.0  ;;  %v360_v26 = vmul.f32 %v613_v23, %v327_v24  ;;  %vm347_vm1 = vcmp.gt.f32.partialorder %v331_v25, 0.0  ;;  %v364_v27 = vmul.f32 %v613_v23, %v331_v25 }
  0xa5   :  { %v376_v28 = vsel %vm343_vm0, %v327_v24, %v360_v26  ;;  %v380_v29 = vsel %vm347_vm1, %v331_v25, %v364_v27  ;;  %v219_v30 = vpop.f32.mrf.mxu2  ;;  %v229_v32 = vpop.f32.mrf.mxu3  ;;  %v318_v25 = vld [vmem:[%s738_s4 + $0x38] sm:$0xff] }
  0xa6   :  { %392 = vst [vmem:[%s740_s5] sm:$0xff] %v376_v28  ;;  %v303_v34 = vadd.f32 %v600_v16, %v219_v30  ;;  %v307_v35 = vadd.f32 %v600_v16, %v229_v32  ;;  %v201_v36 = vpop.f32.mrf.mxu0  ;;  %v211_v38 = vpop.f32.mrf.mxu1 }
  0xa7   :  { %396 = vst [vmem:[%s740_s5 + $0x20] sm:$0xff] %v380_v29  ;;  %v296_v40 = vadd.f32 %v600_v16, %v201_v36  ;;  %v300_v41 = vadd.f32 %v600_v16, %v211_v38 }
  0xa8   :  { %v335_v42 = vadd.f32 %v319_v31, %v303_v34  ;;  %v339_v43 = vadd.f32 %v323_v33, %v307_v35 }
  0xa9   :  { %v328_v44 = vadd.f32 %v312_v37, %v296_v40  ;;  %v332_v45 = vadd.f32 %v316_v39, %v300_v41  ;;  %v322_v41 = vld [vmem:[%s738_s4 + $0x58] sm:$0xff] }
  0xaa   :  { %vm351_vm2 = vcmp.gt.f32.partialorder %v335_v42, 0.0  ;;  %v368_v46 = vmul.f32 %v613_v23, %v335_v42  ;;  %vm355_vm3 = vcmp.gt.f32.partialorder %v339_v43, 0.0  ;;  %v372_v47 = vmul.f32 %v613_v23, %v339_v43 }
  0xab   :  { %vm344_vm4 = vcmp.gt.f32.partialorder %v328_v44, 0.0  ;;  %v361_v48 = vmul.f32 %v613_v23, %v328_v44  ;;  %vm348_vm5 = vcmp.gt.f32.partialorder %v332_v45, 0.0  ;;  %v365_v49 = vmul.f32 %v613_v23, %v332_v45 }
  0xac   :  { %v384_v50 = vsel %vm351_vm2, %v335_v42, %v368_v46  ;;  %v388_v51 = vsel %vm355_vm3, %v339_v43, %v372_v47  ;;  %v326_v43 = vld [vmem:[%s738_s4 + $0x78] sm:$0xff] }
  0xad   :  { %400 = vst [vmem:[%s740_s5 + $0x40] sm:$0xff] %v384_v50  ;;  %v377_v52 = vsel %vm344_vm4, %v328_v44, %v361_v48  ;;  %v381_v53 = vsel %vm348_vm5, %v332_v45, %v365_v49  ;;  %v221_v54 = vpop.f32.mrf.mxu2  ;;  %v231_v56 = vpop.f32.mrf.mxu3 }
  0xae   :  { %404 = vst [vmem:[%s740_s5 + $0x60] sm:$0xff] %v388_v51  ;;  %v304_v58 = vadd.f32 %v600_v16, %v221_v54  ;;  %v308_v59 = vadd.f32 %v600_v16, %v231_v56  ;;  %v204_v60 = vpop.f32.mrf.mxu0  ;;  %v214_v62 = vpop.f32.mrf.mxu1 }
  0xaf   :  { %393 = vst [vmem:[%s740_s5 + $0x8] sm:$0xff] %v377_v52  ;;  %v297_v0 = vadd.f32 %v600_v16, %v204_v60  ;;  %v301_v1 = vadd.f32 %v600_v16, %v214_v62 }
  0xb0   :  { %397 = vst [vmem:[%s740_s5 + $0x28] sm:$0xff] %v381_v53  ;;  %v336_v2 = vadd.f32 %v320_v55, %v304_v58  ;;  %v340_v3 = vadd.f32 %v324_v57, %v308_v59 }
  0xb1   :  { %v329_v4 = vadd.f32 %v313_v61, %v297_v0  ;;  %v333_v5 = vadd.f32 %v317_v63, %v301_v1 }
  0xb2   :  { %vm352_vm6 = vcmp.gt.f32.partialorder %v336_v2, 0.0  ;;  %v369_v6 = vmul.f32 %v613_v23, %v336_v2  ;;  %vm356_vm7 = vcmp.gt.f32.partialorder %v340_v3, 0.0  ;;  %v373_v7 = vmul.f32 %v613_v23, %v340_v3 }
  0xb3   :  { %vm345_vm8 = vcmp.gt.f32.partialorder %v329_v4, 0.0  ;;  %v362_v8 = vmul.f32 %v613_v23, %v329_v4  ;;  %vm349_vm9 = vcmp.gt.f32.partialorder %v333_v5, 0.0  ;;  %v366_v9 = vmul.f32 %v613_v23, %v333_v5 }
  0xb4   :  { %v385_v10 = vsel %vm352_vm6, %v336_v2, %v369_v6  ;;  %v389_v11 = vsel %vm356_vm7, %v340_v3, %v373_v7 }
  0xb5   :  { %401 = vst [vmem:[%s740_s5 + $0x48] sm:$0xff] %v385_v10  ;;  %v378_v12 = vsel %vm345_vm8, %v329_v4, %v362_v8  ;;  %v382_v13 = vsel %vm349_vm9, %v333_v5, %v366_v9  ;;  %v224_v14 = vpop.f32.mrf.mxu2  ;;  %v234_v17 = vpop.f32.mrf.mxu3 }
  0xb6   :  { %405 = vst [vmem:[%s740_s5 + $0x68] sm:$0xff] %v389_v11  ;;  %v305_v19 = vadd.f32 %v600_v16, %v224_v14  ;;  %v309_v20 = vadd.f32 %v600_v16, %v234_v17  ;;  %v206_v21 = vpop.f32.mrf.mxu0  ;;  %v216_v24 = vpop.f32.mrf.mxu1 }
  0xb7   :  { %394 = vst [vmem:[%s740_s5 + $0x10] sm:$0xff] %v378_v12  ;;  %v298_v26 = vadd.f32 %v600_v16, %v206_v21  ;;  %v302_v27 = vadd.f32 %v600_v16, %v216_v24 }
  0xb8   :  { %398 = vst [vmem:[%s740_s5 + $0x30] sm:$0xff] %v382_v13  ;;  %v337_v28 = vadd.f32 %v321_v15, %v305_v19  ;;  %v341_v29 = vadd.f32 %v325_v18, %v309_v20 }
  0xb9   :  { %v330_v30 = vadd.f32 %v314_v22, %v298_v26  ;;  %v334_v31 = vadd.f32 %v318_v25, %v302_v27 }
  0xba   :  { %vm353_vm10 = vcmp.gt.f32.partialorder %v337_v28, 0.0  ;;  %v370_v32 = vmul.f32 %v613_v23, %v337_v28  ;;  %vm357_vm11 = vcmp.gt.f32.partialorder %v341_v29, 0.0  ;;  %v374_v33 = vmul.f32 %v613_v23, %v341_v29 }
  0xbb   :  { %vm346_vm12 = vcmp.gt.f32.partialorder %v330_v30, 0.0  ;;  %v363_v34 = vmul.f32 %v613_v23, %v330_v30  ;;  %vm350_vm13 = vcmp.gt.f32.partialorder %v334_v31, 0.0  ;;  %v367_v35 = vmul.f32 %v613_v23, %v334_v31 }
  0xbc   :  { %v386_v36 = vsel %vm353_vm10, %v337_v28, %v370_v32  ;;  %v390_v37 = vsel %vm357_vm11, %v341_v29, %v374_v33 }
  0xbd   :  { %402 = vst [vmem:[%s740_s5 + $0x50] sm:$0xff] %v386_v36  ;;  %v379_v38 = vsel %vm346_vm12, %v330_v30, %v363_v34  ;;  %v383_v39 = vsel %vm350_vm13, %v334_v31, %v367_v35  ;;  %v226_v40 = vpop.f32.mrf.mxu2  ;;  %v236_v42 = vpop.f32.mrf.mxu3 }
  0xbe   :  { %406 = vst [vmem:[%s740_s5 + $0x70] sm:$0xff] %v390_v37  ;;  %v306_v44 = vadd.f32 %v600_v16, %v226_v40  ;;  %v310_v45 = vadd.f32 %v600_v16, %v236_v42 }
  0xbf   :  { %395 = vst [vmem:[%s740_s5 + $0x18] sm:$0xff] %v379_v38 }
  0xc0   :  { %399 = vst [vmem:[%s740_s5 + $0x38] sm:$0xff] %v383_v39  ;;  %v338_v46 = vadd.f32 %v322_v41, %v306_v44  ;;  %v342_v47 = vadd.f32 %v326_v43, %v310_v45 }
  0xc2   :  { %vm354_vm14 = vcmp.gt.f32.partialorder %v338_v46, 0.0  ;;  %v371_v48 = vmul.f32 %v613_v23, %v338_v46  ;;  %vm358_vm15 = vcmp.gt.f32.partialorder %v342_v47, 0.0  ;;  %v375_v49 = vmul.f32 %v613_v23, %v342_v47 }
  0xc4   :  { %v387_v50 = vsel %vm354_vm14, %v338_v46, %v371_v48  ;;  %v391_v51 = vsel %vm358_vm15, %v342_v47, %v375_v49 }
  0xc5   :  { %403 = vst [vmem:[%s740_s5 + $0x58] sm:$0xff] %v387_v50 }
  0xc6   :  { %407 = vst [vmem:[%s740_s5 + $0x78] sm:$0xff] %v391_v51 }

// kernel: hypergraph_structural_layer_forward.2
= control target key start
LH: loop header
LB: loop body
LE: loop exit
PB: predicated region body
PF: predicated region fallthrough
CT: control target
= control target key end

     0   :  { %s647_s2 = inlined_call_operand.vmem [shape: bf16[128,128], index: 2, kind: input, shape index: {}]   ;;  %s648_s3 = inlined_call_operand.vmem [shape: f32[1,128], index: 3, kind: input, shape index: {}]   ;;  %s649_s1 = inlined_call_operand.vmem [shape: bf16[128,128], index: 1, kind: input, shape index: {}]   ;;  %s650_s0 = inlined_call_operand.<no memory space> [shape: f32[1,1], index: 0, kind: input, shape index: {}]   ;;  %s651_s4 = inlined_call_operand.vmem [shape: f32[128,128], index: 4, kind: output, shape index: {}]  }
   0x1   :  { %v450_v0 = vld [vmem:[%s647_s2 + $0x38] sm:$0xff]  ;;  %v449_v1 = vld [vmem:[%s647_s2 + $0x30] sm:$0xff]  ;;  %v448_v2 = vld [vmem:[%s647_s2 + $0x28] sm:$0xff]  ;;  %v565_v18 = vstv %s650_s0 }
   0x2   :  { %187 = vmatpush.bf16.msra.mxu0 %v450_v0  ;;  %459 = vmatpush.bf16.msra.mxu1 %v450_v0  ;;  %v447_v3 = vld [vmem:[%s647_s2 + $0x20] sm:$0xff]  ;;  %v446_v4 = vld [vmem:[%s647_s2 + $0x18] sm:$0xff]  ;;  %v445_v5 = vld [vmem:[%s647_s2 + $0x10] sm:$0xff] }
   0x3   :  { %460 = vmatpush.bf16.msra.mxu2 %v450_v0  ;;  %461 = vmatpush.bf16.msra.mxu3 %v450_v0  ;;  %v444_v6 = vld [vmem:[%s647_s2 + $0x8] sm:$0xff]  ;;  %v443_v7 = vld [vmem:[%s647_s2] sm:$0xff]  ;;  %v453_v9 = vld [vmem:[%s649_s1 + $0x10] sm:$0xff] }
   0x4   :  { %v451_v8 = vld [vmem:[%s649_s1] sm:$0xff]  ;;  %v457_v11 = vld [vmem:[%s649_s1 + $0x30] sm:$0xff]  ;;  %v452_v12 = vld [vmem:[%s649_s1 + $0x8] sm:$0xff] }
   0x5   :  { %v455_v10 = vld [vmem:[%s649_s1 + $0x20] sm:$0xff]  ;;  %v454_v13 = vld [vmem:[%s649_s1 + $0x18] sm:$0xff]  ;;  %v456_v14 = vld [vmem:[%s649_s1 + $0x28] sm:$0xff] }
   0x6   :  { %188 = vmatpush.bf16.msra.mxu0 %v449_v1  ;;  %462 = vmatpush.bf16.msra.mxu1 %v449_v1  ;;  %v458_v15 = vld [vmem:[%s649_s1 + $0x38] sm:$0xff]  ;;  %v560_v16 = vld [vmem:[%s648_s3] ss:$0 sm:$0xff] }
   0x7   :  { %463 = vmatpush.bf16.msra.mxu2 %v449_v1  ;;  %464 = vmatpush.bf16.msra.mxu3 %v449_v1 }
   0xa   :  { %189 = vmatpush.bf16.msra.mxu0 %v448_v2  ;;  %465 = vmatpush.bf16.msra.mxu1 %v448_v2 }
   0xb   :  { %466 = vmatpush.bf16.msra.mxu2 %v448_v2  ;;  %467 = vmatpush.bf16.msra.mxu3 %v448_v2 }
   0xe   :  { %190 = vmatpush.bf16.msra.mxu0 %v447_v3  ;;  %468 = vmatpush.bf16.msra.mxu1 %v447_v3 }
   0xf   :  { %469 = vmatpush.bf16.msra.mxu2 %v447_v3  ;;  %470 = vmatpush.bf16.msra.mxu3 %v447_v3 }
  0x12   :  { %191 = vmatpush.bf16.msra.mxu0 %v446_v4  ;;  %471 = vmatpush.bf16.msra.mxu1 %v446_v4 }
  0x13   :  { %472 = vmatpush.bf16.msra.mxu2 %v446_v4  ;;  %473 = vmatpush.bf16.msra.mxu3 %v446_v4 }
  0x16   :  { %192 = vmatpush.bf16.msra.mxu0 %v445_v5  ;;  %474 = vmatpush.bf16.msra.mxu1 %v445_v5 }
  0x17   :  { %475 = vmatpush.bf16.msra.mxu2 %v445_v5  ;;  %476 = vmatpush.bf16.msra.mxu3 %v445_v5 }
  0x1a   :  { %193 = vmatpush.bf16.msra.mxu0 %v444_v6  ;;  %477 = vmatpush.bf16.msra.mxu1 %v444_v6 }
  0x1b   :  { %478 = vmatpush.bf16.msra.mxu2 %v444_v6  ;;  %479 = vmatpush.bf16.msra.mxu3 %v444_v6 }
  0x1e   :  { %194 = vmatpush.bf16.msra.mxu0 %v443_v7  ;;  %480 = vmatpush.bf16.msra.mxu1 %v443_v7 }
  0x1f   :  { %481 = vmatpush.bf16.msra.mxu2 %v443_v7  ;;  %482 = vmatpush.bf16.msra.mxu3 %v443_v7 }
  0x21   :  { %195 = vmatmul.bf16.vlgmr.msra.gmra.mxu0 %v451_v8  ;;  %205 = vmatmul.bf16.vlgmr.msra.gmra.mxu1 %v453_v9 }
  0x22   :  { %215 = vmatmul.bf16.vlgmr.msra.gmra.mxu2 %v455_v10  ;;  %225 = vmatmul.bf16.vlgmr.msra.gmra.mxu3 %v457_v11 }
  0x31   :  { %200 = vmatmul.bf16.gmra.mxu0 %v452_v12  ;;  %210 = vmatmul.bf16.gmra.mxu1 %v454_v13 }
  0x32   :  { %220 = vmatmul.bf16.gmra.mxu2 %v456_v14  ;;  %230 = vmatmul.bf16.gmra.mxu3 %v458_v15 }
  0x9e   :  { %v196_v17 = vpop.f32.mrf.mxu0  ;;  %v206_v19 = vpop.f32.mrf.mxu1 }
  0x9f   :  { %v292_v20 = vadd.f32 %v560_v16, %v196_v17  ;;  %v296_v21 = vadd.f32 %v560_v16, %v206_v19 }
  0xa1   :  { %vm308_vm0 = vcmp.gt.f32.partialorder %v292_v20, 0.0  ;;  %v325_v22 = vmul.f32 %v565_v18, %v292_v20  ;;  %vm312_vm1 = vcmp.gt.f32.partialorder %v296_v21, 0.0  ;;  %v329_v23 = vmul.f32 %v565_v18, %v296_v21 }
  0xa3   :  { %v341_v24 = vsel %vm308_vm0, %v292_v20, %v325_v22  ;;  %v345_v25 = vsel %vm312_vm1, %v296_v21, %v329_v23 }
  0xa4   :  { %357 = vst [vmem:[%s651_s4] sm:$0xff] %v341_v24 }
  0xa5   :  { %361 = vst [vmem:[%s651_s4 + $0x20] sm:$0xff] %v345_v25  ;;  %v216_v26 = vpop.f32.mrf.mxu2  ;;  %v226_v27 = vpop.f32.mrf.mxu3 }
  0xa6   :  { %v300_v28 = vadd.f32 %v560_v16, %v216_v26  ;;  %v304_v29 = vadd.f32 %v560_v16, %v226_v27  ;;  %v198_v30 = vpop.f32.mrf.mxu0  ;;  %v208_v31 = vpop.f32.mrf.mxu1 }
  0xa7   :  { %v293_v32 = vadd.f32 %v560_v16, %v198_v30  ;;  %v297_v33 = vadd.f32 %v560_v16, %v208_v31 }
  0xa8   :  { %vm316_vm2 = vcmp.gt.f32.partialorder %v300_v28, 0.0  ;;  %v333_v34 = vmul.f32 %v565_v18, %v300_v28  ;;  %vm320_vm3 = vcmp.gt.f32.partialorder %v304_v29, 0.0  ;;  %v337_v35 = vmul.f32 %v565_v18, %v304_v29 }
  0xa9   :  { %vm309_vm4 = vcmp.gt.f32.partialorder %v293_v32, 0.0  ;;  %v326_v36 = vmul.f32 %v565_v18, %v293_v32  ;;  %vm313_vm5 = vcmp.gt.f32.partialorder %v297_v33, 0.0  ;;  %v330_v37 = vmul.f32 %v565_v18, %v297_v33 }
  0xaa   :  { %v349_v38 = vsel %vm316_vm2, %v300_v28, %v333_v34  ;;  %v353_v39 = vsel %vm320_vm3, %v304_v29, %v337_v35 }
  0xab   :  { %365 = vst [vmem:[%s651_s4 + $0x40] sm:$0xff] %v349_v38  ;;  %v342_v40 = vsel %vm309_vm4, %v293_v32, %v326_v36  ;;  %v346_v41 = vsel %vm313_vm5, %v297_v33, %v330_v37 }
  0xac   :  { %369 = vst [vmem:[%s651_s4 + $0x60] sm:$0xff] %v353_v39 }
  0xad   :  { %358 = vst [vmem:[%s651_s4 + $0x8] sm:$0xff] %v342_v40  ;;  %v218_v42 = vpop.f32.mrf.mxu2  ;;  %v228_v43 = vpop.f32.mrf.mxu3 }
  0xae   :  { %362 = vst [vmem:[%s651_s4 + $0x28] sm:$0xff] %v346_v41  ;;  %v301_v44 = vadd.f32 %v560_v16, %v218_v42  ;;  %v305_v45 = vadd.f32 %v560_v16, %v228_v43  ;;  %v201_v46 = vpop.f32.mrf.mxu0  ;;  %v211_v47 = vpop.f32.mrf.mxu1 }
  0xaf   :  { %v294_v48 = vadd.f32 %v560_v16, %v201_v46  ;;  %v298_v49 = vadd.f32 %v560_v16, %v211_v47 }
  0xb0   :  { %vm317_vm6 = vcmp.gt.f32.partialorder %v301_v44, 0.0  ;;  %v334_v50 = vmul.f32 %v565_v18, %v301_v44  ;;  %vm321_vm7 = vcmp.gt.f32.partialorder %v305_v45, 0.0  ;;  %v338_v51 = vmul.f32 %v565_v18, %v305_v45 }
  0xb1   :  { %vm310_vm8 = vcmp.gt.f32.partialorder %v294_v48, 0.0  ;;  %v327_v52 = vmul.f32 %v565_v18, %v294_v48  ;;  %vm314_vm9 = vcmp.gt.f32.partialorder %v298_v49, 0.0  ;;  %v331_v53 = vmul.f32 %v565_v18, %v298_v49 }
  0xb2   :  { %v350_v54 = vsel %vm317_vm6, %v301_v44, %v334_v50  ;;  %v354_v55 = vsel %vm321_vm7, %v305_v45, %v338_v51 }
  0xb3   :  { %366 = vst [vmem:[%s651_s4 + $0x48] sm:$0xff] %v350_v54  ;;  %v343_v56 = vsel %vm310_vm8, %v294_v48, %v327_v52  ;;  %v347_v57 = vsel %vm314_vm9, %v298_v49, %v331_v53 }
  0xb4   :  { %370 = vst [vmem:[%s651_s4 + $0x68] sm:$0xff] %v354_v55 }
  0xb5   :  { %359 = vst [vmem:[%s651_s4 + $0x10] sm:$0xff] %v343_v56  ;;  %v221_v58 = vpop.f32.mrf.mxu2  ;;  %v231_v59 = vpop.f32.mrf.mxu3 }
  0xb6   :  { %363 = vst [vmem:[%s651_s4 + $0x30] sm:$0xff] %v347_v57  ;;  %v302_v60 = vadd.f32 %v560_v16, %v221_v58  ;;  %v306_v61 = vadd.f32 %v560_v16, %v231_v59  ;;  %v203_v62 = vpop.f32.mrf.mxu0  ;;  %v213_v63 = vpop.f32.mrf.mxu1 }
  0xb7   :  { %v295_v0 = vadd.f32 %v560_v16, %v203_v62  ;;  %v299_v1 = vadd.f32 %v560_v16, %v213_v63 }
  0xb8   :  { %vm318_vm10 = vcmp.gt.f32.partialorder %v302_v60, 0.0  ;;  %v335_v2 = vmul.f32 %v565_v18, %v302_v60  ;;  %vm322_vm11 = vcmp.gt.f32.partialorder %v306_v61, 0.0  ;;  %v339_v3 = vmul.f32 %v565_v18, %v306_v61 }
  0xb9   :  { %vm311_vm12 = vcmp.gt.f32.partialorder %v295_v0, 0.0  ;;  %v328_v4 = vmul.f32 %v565_v18, %v295_v0  ;;  %vm315_vm13 = vcmp.gt.f32.partialorder %v299_v1, 0.0  ;;  %v332_v5 = vmul.f32 %v565_v18, %v299_v1 }
  0xba   :  { %v351_v6 = vsel %vm318_vm10, %v302_v60, %v335_v2  ;;  %v355_v7 = vsel %vm322_vm11, %v306_v61, %v339_v3 }
  0xbb   :  { %367 = vst [vmem:[%s651_s4 + $0x50] sm:$0xff] %v351_v6  ;;  %v344_v8 = vsel %vm311_vm12, %v295_v0, %v328_v4  ;;  %v348_v9 = vsel %vm315_vm13, %v299_v1, %v332_v5 }
  0xbc   :  { %371 = vst [vmem:[%s651_s4 + $0x70] sm:$0xff] %v355_v7 }
  0xbd   :  { %360 = vst [vmem:[%s651_s4 + $0x18] sm:$0xff] %v344_v8  ;;  %v223_v10 = vpop.f32.mrf.mxu2  ;;  %v233_v11 = vpop.f32.mrf.mxu3 }
  0xbe   :  { %364 = vst [vmem:[%s651_s4 + $0x38] sm:$0xff] %v348_v9  ;;  %v303_v12 = vadd.f32 %v560_v16, %v223_v10  ;;  %v307_v13 = vadd.f32 %v560_v16, %v233_v11 }
  0xc0   :  { %vm319_vm14 = vcmp.gt.f32.partialorder %v303_v12, 0.0  ;;  %v336_v14 = vmul.f32 %v565_v18, %v303_v12  ;;  %vm323_vm15 = vcmp.gt.f32.partialorder %v307_v13, 0.0  ;;  %v340_v15 = vmul.f32 %v565_v18, %v307_v13 }
  0xc2   :  { %v352_v17 = vsel %vm319_vm14, %v303_v12, %v336_v14  ;;  %v356_v19 = vsel %vm323_vm15, %v307_v13, %v340_v15 }
  0xc3   :  { %368 = vst [vmem:[%s651_s4 + $0x58] sm:$0xff] %v352_v17 }
  0xc4   :  { %372 = vst [vmem:[%s651_s4 + $0x78] sm:$0xff] %v356_v19 }

</bundles_post_ra>
